<compile_context>
chip_gen: v7x
topology: tpu7x:2x2x1
jax: 0.10.0
libtpu: 0.0.40
codegen_flags: <defaults>
</compile_context>

<pallas_src>
import jax
import jax.numpy as jnp
from jax.experimental import pallas as pl
from jax.experimental.pallas import tpu as pltpu


def _round_up(x, m):
    return ((x + m - 1) // m) * m


# ---------------------------------------------------------------------------
# Fused BN(affine) -> ReLU -> 2x2 avg pool -> 1x1 (transposed) conv, with the
# pool folded into the matmul contraction dimension.
#
# patches_ref: (TILE_M, K_pad)    bf16  -- row = one 2x2 window, cols = 4 taps x Cin
# w_ref:       (K_pad, Cout_pad)  bf16  -- 4x-tiled 1x1 conv weight, pre-scaled by 0.25
# scale_ref:   (1, K_pad)         f32   -- gamma * rsqrt(var + eps), tiled over taps
# shift_ref:   (1, K_pad)         f32   -- beta  - mean * scale,     tiled over taps
# out_ref:     (TILE_M, Cout_pad) bf16
# ---------------------------------------------------------------------------
def _tb1_kernel(patches_ref, w_ref, scale_ref, shift_ref, out_ref):
    z = patches_ref[...].astype(jnp.float32)                   # one bf16->f32 cast per block
    a = jnp.maximum(z * scale_ref[...] + shift_ref[...], 0.0)  # BN + ReLU (f32 VPU, v5e-safe)
    y = jnp.dot(a.astype(jnp.bfloat16), w_ref[...],
                preferred_element_type=jnp.float32)            # MXU: pool folded into K
    out_ref[...] = y.astype(out_ref.dtype)


# ---------------------------------------------------------------------------
# Wrapper
# ---------------------------------------------------------------------------
def transition_block1_forward(x_nchw, params, *, eps=1e-5, max_tile_m=2048):
    w = params["conv1_w"]                       # ConvTranspose2d weight: (Cin, Cout, 1, 1)
    gamma = params["bn1_gamma"].astype(jnp.float32)
    beta = params["bn1_beta"].astype(jnp.float32)

    B, Cin, H, W = x_nchw.shape
    Cout = w.shape[1]
    assert H % 2 == 0 and W % 2 == 0, "even spatial dims expected for avg_pool2d(2)"
    Ho, Wo = H // 2, W // 2
    Mo = B * Ho * Wo
    K = 4 * Cin

    K_pad = _round_up(K, 128)
    Cout_pad = _round_up(Cout, 128)

    # ---- BatchNorm batch statistics (training mode, biased var) via plain XLA ----
    # Two-pass mean/var on the unpadded input: cheap, fuses with the layout transform,
    # and avoids the cancellation-prone single-pass E[x^2]-E[x]^2 formulation.
    xf = x_nchw.astype(jnp.float32)
    mean = jnp.mean(xf, axis=(0, 2, 3))                                # (Cin,)
    var = jnp.mean(jnp.square(xf - mean.reshape(1, Cin, 1, 1)), axis=(0, 2, 3))
    scale_c = gamma * jax.lax.rsqrt(var + eps)                         # (Cin,)
    shift_c = beta - mean * scale_c                                    # (Cin,)

    # Tile BN affine params over the 4 pooling taps (K is tap-major, channel-minor).
    scale = jnp.pad(jnp.tile(scale_c, 4), (0, K_pad - K)).reshape(1, K_pad)
    shift = jnp.pad(jnp.tile(shift_c, 4), (0, K_pad - K)).reshape(1, K_pad)

    # ConvTranspose2d 1x1 (s=1, p=0, no bias) == channel matmul with weight (Cin, Cout).
    # avg_pool2d(2) commutes with it -> fold the 4-tap average into the contraction:
    # tile the weight 4x along K and pre-scale by 0.25.
    w_mat = w.reshape(Cin, Cout).astype(jnp.float32)
    w_tiled = 0.25 * jnp.tile(w_mat, (4, 1))                           # (4*Cin, Cout)
    w_tiled = jnp.pad(w_tiled, ((0, K_pad - K), (0, Cout_pad - Cout))).astype(jnp.bfloat16)

    # NCHW -> (Mo, 4*Cin): each row holds the 4 taps of one 2x2 pooling window.
    x = jnp.transpose(x_nchw, (0, 2, 3, 1))                            # (B, H, W, Cin)
    x = x.reshape(B, Ho, 2, Wo, 2, Cin)
    x = jnp.transpose(x, (0, 1, 3, 2, 4, 5)).reshape(Mo, K)            # (Mo, 4*Cin)

    # ---- tile_m from a real double-buffered VMEM budget (v7x has only 64 MiB) ----
    try:
        vmem_cap = int(pltpu.get_tpu_info().vmem_capacity_bytes)
    except Exception:
        vmem_cap = 64 * 1024 * 1024                                    # v7x-safe fallback
    vmem_limit = min(int(vmem_cap * 0.7), 96 * 1024 * 1024)
    fixed_bytes = 2 * K_pad * Cout_pad * 2 + 4 * K_pad * 4             # weight (2 bufs) + scale/shift
    per_row = 2 * (K_pad + Cout_pad) * 2                               # 2x-buffered bf16 in + out
    budget_rows = max(8, ((int(vmem_limit * 0.85) - fixed_bytes) // per_row) // 8 * 8)
    tile_m = int(min(max_tile_m, budget_rows, _round_up(Mo, 8)))
    Mo_pad = _round_up(Mo, tile_m)
    grid = (Mo_pad // tile_m,)

    # bf16 staging of the streamed array: half the HBM bytes of the dominant input.
    patches = jnp.pad(x.astype(jnp.bfloat16), ((0, Mo_pad - Mo), (0, K_pad - K)))

    flops = 2 * Mo_pad * K_pad * Cout_pad
    bytes_accessed = (patches.size * 2 + w_tiled.size * 2
                      + 2 * K_pad * 4 + Mo_pad * Cout_pad * 2)

    out = pl.pallas_call(
        _tb1_kernel,
        out_shape=jax.ShapeDtypeStruct((Mo_pad, Cout_pad), jnp.bfloat16),
        grid=grid,
        in_specs=[
            pl.BlockSpec((tile_m, K_pad), lambda i: (i, 0)),
            pl.BlockSpec((K_pad, Cout_pad), lambda i: (0, 0)),
            pl.BlockSpec((1, K_pad), lambda i: (0, 0)),
            pl.BlockSpec((1, K_pad), lambda i: (0, 0)),
        ],
        out_specs=pl.BlockSpec((tile_m, Cout_pad), lambda i: (i, 0)),
        compiler_params=pltpu.CompilerParams(
            dimension_semantics=("parallel",),
            vmem_limit_bytes=vmem_limit),
        cost_estimate=pl.CostEstimate(flops=flops, transcendentals=0,
                                      bytes_accessed=bytes_accessed),
    )(patches, w_tiled, scale, shift)

    out = out[:Mo, :Cout].astype(jnp.float32).reshape(B, Ho, Wo, Cout)
    return jnp.transpose(out, (0, 3, 1, 2))                            # NHWC -> NCHW


# ---------------------------------------------------------------------------
# Pure-JAX reference (mirrors the PyTorch forward) for a correctness check
# ---------------------------------------------------------------------------
def _reference(x, params, eps=1e-5):
    w = params["conv1_w"]
    g = params["bn1_gamma"].reshape(1, -1, 1, 1)
    b = params["bn1_beta"].reshape(1, -1, 1, 1)
    mean = jnp.mean(x, axis=(0, 2, 3), keepdims=True)
    var = jnp.mean(jnp.square(x - mean), axis=(0, 2, 3), keepdims=True)
    xn = (x - mean) * jax.lax.rsqrt(var + eps) * g + b
    xr = jnp.maximum(xn, 0.0)
    w_mat = w.reshape(w.shape[0], w.shape[1])                          # (Cin, Cout)
    y = jnp.einsum('nchw,cd->ndhw', xr, w_mat)
    B, D, H, W = y.shape
    return y.reshape(B, D, H // 2, 2, W // 2, 2).mean(axis=(3, 5))


if __name__ == "__main__":
    key = jax.random.PRNGKey(0)
    k_w, k_x = jax.random.split(key)

    B, Cin, H, W = 2, 32, 16, 16
    Cout = 16
    params = {
        "conv1_w": 0.1 * jax.random.normal(k_w, (Cin, Cout, 1, 1), jnp.float32),
        "bn1_gamma": jnp.ones((Cin,), jnp.float32),   # fresh BatchNorm2d init
        "bn1_beta": jnp.zeros((Cin,), jnp.float32),
    }
    x = jax.random.normal(k_x, (B, Cin, H, W), jnp.float32)            # NCHW like PyTorch

    fwd = jax.jit(lambda xx: transition_block1_forward(xx, params))
    out = fwd(x)
    jax.block_until_ready(out)

    assert out.shape == (B, Cout, H // 2, W // 2), out.shape
    ref = _reference(x, params)
    max_err = float(jnp.max(jnp.abs(out - ref)))
    assert max_err < 5e-2, f"max abs error vs reference: {max_err}"
    print("KERNEL_OK")
</pallas_src>

<mosaic_0001>
module attributes {stable_mosaic.version = 11 : i64} {
  func.func @_tb1_kernel(%arg0: i32, %arg1: memref<128x128xbf16, #tpu.memory_space<vmem>>, %arg2: memref<128x128xbf16, #tpu.memory_space<vmem>>, %arg3: memref<1x128xf32, #tpu.memory_space<vmem>>, %arg4: memref<1x128xf32, #tpu.memory_space<vmem>>, %arg5: memref<128x128xbf16, #tpu.memory_space<vmem>>) attributes {dimension_semantics = [#tpu.dimension_semantics<parallel>], iteration_bounds = array<i64: 1>, scalar_prefetch = 0 : i64, scratch_operands = 0 : i64, tpu.core_type = #tpu.core_type<tc>, window_params = [{transform_indices = @transform_0, window_bounds = array<i64: 128, 128>}, {pipeline_mode = #tpu.pipeline_mode<synchronous>, transform_indices = @transform_1, window_bounds = array<i64: 128, 128>}, {pipeline_mode = #tpu.pipeline_mode<synchronous>, transform_indices = @transform_2, window_bounds = array<i64: 1, 128>}, {pipeline_mode = #tpu.pipeline_mode<synchronous>, transform_indices = @transform_3, window_bounds = array<i64: 1, 128>}, {transform_indices = @transform_4, window_bounds = array<i64: 128, 128>}]} {
    %c0 = arith.constant 0 : index
    %c0_0 = arith.constant 0 : index
    %0 = vector.load %arg1[%c0, %c0_0] : memref<128x128xbf16, #tpu.memory_space<vmem>>, vector<128x128xbf16>
    %1 = arith.extf %0 : vector<128x128xbf16> to vector<128x128xf32>
    %c0_1 = arith.constant 0 : index
    %c0_2 = arith.constant 0 : index
    %2 = vector.load %arg3[%c0_1, %c0_2] : memref<1x128xf32, #tpu.memory_space<vmem>>, vector<1x128xf32>
    %3 = vector.broadcast %2 : vector<1x128xf32> to vector<128x128xf32>
    %4 = arith.mulf %1, %3 : vector<128x128xf32>
    %c0_3 = arith.constant 0 : index
    %c0_4 = arith.constant 0 : index
    %5 = vector.load %arg4[%c0_3, %c0_4] : memref<1x128xf32, #tpu.memory_space<vmem>>, vector<1x128xf32>
    %6 = vector.broadcast %5 : vector<1x128xf32> to vector<128x128xf32>
    %7 = arith.addf %4, %6 : vector<128x128xf32>
    %cst = arith.constant 0.000000e+00 : f32
    %8 = vector.broadcast %cst : f32 to vector<128x128xf32>
    %9 = arith.maximumf %7, %8 : vector<128x128xf32>
    %10 = arith.truncf %9 : vector<128x128xf32> to vector<128x128xbf16>
    %c0_5 = arith.constant 0 : index
    %c0_6 = arith.constant 0 : index
    %11 = vector.load %arg2[%c0_5, %c0_6] : memref<128x128xbf16, #tpu.memory_space<vmem>>, vector<128x128xbf16>
    %cst_7 = arith.constant dense<0.000000e+00> : vector<128x128xf32>
    %12 = tpu.matmul %10, %11, %cst_7 {dimension_numbers = #tpu.dot_dimension_numbers<[1], [0], [0], [1], [0, 0, 1, 1], [], []>} : vector<128x128xbf16>, vector<128x128xbf16>, vector<128x128xf32> -> vector<128x128xf32>
    %13 = arith.truncf %12 : vector<128x128xf32> to vector<128x128xbf16>
    %c0_8 = arith.constant 0 : index
    %c0_9 = arith.constant 0 : index
    %14 = vector.load %arg5[%c0_8, %c0_9] : memref<128x128xbf16, #tpu.memory_space<vmem>>, vector<128x128xbf16>
    tpu.vector_store %arg5[%c0_8, %c0_9], %13 {strides = array<i32>} : memref<128x128xbf16, #tpu.memory_space<vmem>>, vector<128x128xbf16>,
    return
  }
  func.func @transform_0(%arg0: i32) -> (i32, i32) {
    %c0_i32 = arith.constant 0 : i32
    %c0_i32_0 = arith.constant 0 : i32
    return %arg0, %c0_i32 : i32, i32
  }
  func.func @transform_1(%arg0: i32) -> (i32, i32) {
    %c0_i32 = arith.constant 0 : i32
    %c0_i32_0 = arith.constant 0 : i32
    %c0_i32_1 = arith.constant 0 : i32
    return %c0_i32, %c0_i32_0 : i32, i32
  }
  func.func @transform_2(%arg0: i32) -> (i32, i32) {
    %c0_i32 = arith.constant 0 : i32
    %c0_i32_0 = arith.constant 0 : i32
    %c0_i32_1 = arith.constant 0 : i32
    return %c0_i32, %c0_i32_0 : i32, i32
  }
  func.func @transform_3(%arg0: i32) -> (i32, i32) {
    %c0_i32 = arith.constant 0 : i32
    %c0_i32_0 = arith.constant 0 : i32
    %c0_i32_1 = arith.constant 0 : i32
    return %c0_i32, %c0_i32_0 : i32, i32
  }
  func.func @transform_4(%arg0: i32) -> (i32, i32) {
    %c0_i32 = arith.constant 0 : i32
    %c0_i32_0 = arith.constant 0 : i32
    return %arg0, %c0_i32 : i32, i32
  }
}

</mosaic_0001>

<bundles_post_ra>
// kernel: tile.17
= control target key start
LH: loop header
LB: loop body
LE: loop exit
PB: predicated region body
PF: predicated region fallthrough
CT: control target
= control target key end

     0   :  { %s22_s0 = inlined_call_operand.vmem [shape: f32[32], index: 0, kind: input, shape index: {}]   ;;  %s23_s1 = inlined_call_operand.vmem [shape: f32[4,32], index: 1, kind: output, shape index: {}]  }
   0x1   :  { %v4_v0 = vld [vmem:[%s22_s0] ss:$0 sm:$0xff] }
   0x2   :  { %5 = vst [vmem:[%s23_s1] sm:$0xf] %v4_v0 }

// kernel: _lambda_.1
= control target key start
LH: loop header
LB: loop body
LE: loop exit
PB: predicated region body
PF: predicated region fallthrough
CT: control target
= control target key end

     0   :  { %s704_s1 = inlined_call_operand.vmem [shape: bf16[128,128], index: 1, kind: input, shape index: {}]   ;;  %s705_s0 = inlined_call_operand.vmem [shape: bf16[128,128], index: 0, kind: input, shape index: {}]   ;;  %s706_s2 = inlined_call_operand.vmem [shape: f32[1,128], index: 2, kind: input, shape index: {}]   ;;  %s707_s3 = inlined_call_operand.vmem [shape: f32[1,128], index: 3, kind: input, shape index: {}]   ;;  %s708_s4 = inlined_call_operand.vmem [shape: bf16[128,128], index: 4, kind: output, shape index: {}]  }
   0x1   :  { %v557_v0 = vld [vmem:[%s704_s1] sm:$0xff]   ;;  %v558_v1 = vld [vmem:[%s704_s1 + $0x8] sm:$0xff]   ;;  %v559_v2 = vld [vmem:[%s704_s1 + $0x10] sm:$0xff]  }
   0x2   :  { %509 = vmatprep.subr.bf16.mxu0 %v557_v0  ;;  %541 = vmatprep.subr.bf16.mxu1 %v557_v0  ;;  %v560_v3 = vld [vmem:[%s704_s1 + $0x18] sm:$0xff]   ;;  %v408_v4 = vld [vmem:[%s705_s0] sm:$0xff]   ;;  %v479_v9 = vld [vmem:[%s705_s0 + $0x8] sm:$0xff]  }
   0x3   :  { %510 = vmatpush3.bf16.msra.mxu0 %v557_v0  ;;  %549 = vmatpush3.bf16.msra.mxu1 %v557_v0  ;;  %v608_v5 = vld [vmem:[%s706_s2] ss:$0 sm:$0xff]  ;;  %v409_v6 = vunpack.c.l.bf16 %v408_v4  ;;  %v410_v7 = vunpack.c.h.bf16 %v408_v4  ;;  %v483_v13 = vld [vmem:[%s705_s0 + $0x28] sm:$0xff]   ;;  %v480_v16 = vld [vmem:[%s705_s0 + $0x10] sm:$0xff]   ;;  %v413_v20 = vunpack.c.l.bf16 %v479_v9  ;;  %v414_v21 = vunpack.c.h.bf16 %v479_v9 }
   0x4   :  { %511 = vmatprep.subr.bf16.mxu0 %v558_v1  ;;  %542 = vmatprep.subr.bf16.mxu1 %v558_v1  ;;  %v482_v8 = vld [vmem:[%s705_s0 + $0x20] sm:$0xff]   ;;  %v429_v24 = vunpack.c.l.bf16 %v483_v13  ;;  %v430_v25 = vunpack.c.h.bf16 %v483_v13  ;;  %v417_v28 = vunpack.c.l.bf16 %v480_v16  ;;  %v484_v31 = vld [vmem:[%s705_s0 + $0x30] sm:$0xff]   ;;  %v562_v32 = vld [vmem:[%s704_s1 + $0x28] sm:$0xff]   ;;  %v418_v40 = vunpack.c.h.bf16 %v480_v16 }
   0x5   :  { %v619_v10 = vld [vmem:[%s707_s3] ss:$0 sm:$0xff]  ;;  %v425_v11 = vunpack.c.l.bf16 %v482_v8  ;;  %v426_v12 = vunpack.c.h.bf16 %v482_v8  ;;  %v57_v14 = vmul.f32 %v409_v6, %v608_v5  ;;  %v58_v15 = vmul.f32 %v410_v7, %v608_v5  ;;  %v481_v44 = vld [vmem:[%s705_s0 + $0x18] sm:$0xff]   ;;  %v563_v48 = vld [vmem:[%s704_s1 + $0x30] sm:$0xff]  }
   0x6   :  { %v561_v17 = vld [vmem:[%s704_s1 + $0x20] sm:$0xff]   ;;  %v59_v35 = vmul.f32 %v413_v20, %v608_v5  ;;  %v60_v36 = vmul.f32 %v414_v21, %v608_v5  ;;  %v67_v38 = vmul.f32 %v429_v24, %v608_v5  ;;  %v68_v39 = vmul.f32 %v430_v25, %v608_v5  ;;  %v485_v47 = vld [vmem:[%s705_s0 + $0x38] sm:$0xff]  }
   0x7   :  { %512 = vmatpush3.bf16.msra.mxu0 %v558_v1  ;;  %550 = vmatpush3.bf16.msra.mxu1 %v558_v1  ;;  %v65_v18 = vmul.f32 %v425_v11, %v608_v5  ;;  %v66_v19 = vmul.f32 %v426_v12, %v608_v5  ;;  %v80_v22 = vadd.f32 %v619_v10, %v57_v14  ;;  %v433_v43 = vunpack.c.l.bf16 %v484_v31  ;;  %v564_v63 = vld [vmem:[%s704_s1 + $0x38] sm:$0xff]  }
   0x8   :  { %513 = vmatprep.subr.bf16.mxu0 %v559_v2  ;;  %543 = vmatprep.subr.bf16.mxu1 %v559_v2  ;;  %v81_v23 = vadd.f32 %v619_v10, %v58_v15  ;;  %v61_v42 = vmul.f32 %v417_v28, %v608_v5  ;;  %v62_v45 = vmul.f32 %v418_v40, %v608_v5  ;;  %v434_v46 = vunpack.c.h.bf16 %v484_v31 }
   0x9   :  { %v88_v26 = vadd.f32 %v619_v10, %v65_v18  ;;  %v89_v27 = vadd.f32 %v619_v10, %v66_v19  ;;  %v96_v29 = vmax.f32 %v80_v22, 0.0  ;;  %v82_v49 = vadd.f32 %v619_v10, %v59_v35 }
   0xa   :  { %v97_v30 = vmax.f32 %v81_v23, 0.0  ;;  %v83_v50 = vadd.f32 %v619_v10, %v60_v36  ;;  %v69_v51 = vmul.f32 %v433_v43, %v608_v5  ;;  %v90_v52 = vadd.f32 %v619_v10, %v67_v38 }
   0xb   :  { %514 = vmatpush3.bf16.msra.mxu0 %v559_v2  ;;  %551 = vmatpush3.bf16.msra.mxu1 %v559_v2  ;;  %v104_v33 = vmax.f32 %v88_v26, 0.0  ;;  %v105_v34 = vmax.f32 %v89_v27, 0.0  ;;  %v91_v53 = vadd.f32 %v619_v10, %v68_v39  ;;  %v70_v54 = vmul.f32 %v434_v46, %v608_v5 }
   0xc   :  { %515 = vmatprep.subr.bf16.mxu0 %v560_v3  ;;  %544 = vmatprep.subr.bf16.mxu1 %v560_v3  ;;  %v112_v37 = vpack.c.bf16 %v97_v30, %v96_v29  ;;  %v421_v55 = vunpack.c.l.bf16 %v481_v44  ;;  %v84_v56 = vadd.f32 %v619_v10, %v61_v42  ;;  %v422_v57 = vunpack.c.h.bf16 %v481_v44 }
   0xd   :  { %v116_v41 = vpack.c.bf16 %v105_v34, %v104_v33  ;;  %v437_v58 = vunpack.c.l.bf16 %v485_v47  ;;  %v438_v59 = vunpack.c.h.bf16 %v485_v47  ;;  %v85_v60 = vadd.f32 %v619_v10, %v62_v45 }
   0xe   :  { %525 = vmatprep.mubr.bf16.mxu0 %v112_v37  ;;  %v92_v61 = vadd.f32 %v619_v10, %v69_v51  ;;  %v93_v62 = vadd.f32 %v619_v10, %v70_v54  ;;  %v98_v0 = vmax.f32 %v82_v49, 0.0  ;;  %v99_v1 = vmax.f32 %v83_v50, 0.0 }
   0xf   :  { %516 = vmatpush3.bf16.msra.mxu0 %v560_v3  ;;  %552 = vmatpush3.bf16.msra.mxu1 %v560_v3  ;;  %v106_v2 = vmax.f32 %v90_v52, 0.0  ;;  %v107_v3 = vmax.f32 %v91_v53, 0.0  ;;  %v63_v4 = vmul.f32 %v421_v55, %v608_v5  ;;  %v64_v6 = vmul.f32 %v422_v57, %v608_v5 }
  0x10   :  { %517 = vmatprep.subr.bf16.mxu0 %v561_v17  ;;  %545 = vmatprep.subr.bf16.mxu1 %v561_v17  ;;  %v71_v7 = vmul.f32 %v437_v58, %v608_v5  ;;  %v72_v8 = vmul.f32 %v438_v59, %v608_v5  ;;  %v100_v9 = vmax.f32 %v84_v56, 0.0  ;;  %v101_v11 = vmax.f32 %v85_v60, 0.0 }
  0x11   :  { %533 = vmatprep.mubr.bf16.mxu1 %v116_v41  ;;  %v108_v12 = vmax.f32 %v92_v61, 0.0  ;;  %v109_v13 = vmax.f32 %v93_v62, 0.0  ;;  %v113_v14 = vpack.c.bf16 %v99_v1, %v98_v0  ;;  %v117_v15 = vpack.c.bf16 %v107_v3, %v106_v2 }
  0x12   :  { %v86_v16 = vadd.f32 %v619_v10, %v63_v4  ;;  %v94_v18 = vadd.f32 %v619_v10, %v71_v7  ;;  %v95_v19 = vadd.f32 %v619_v10, %v72_v8  ;;  %v114_v5 = vpack.c.bf16 %v101_v11, %v100_v9 }
  0x13   :  { %518 = vmatpush3.bf16.msra.mxu0 %v561_v17  ;;  %553 = vmatpush3.bf16.msra.mxu1 %v561_v17  ;;  %v87_v17 = vadd.f32 %v619_v10, %v64_v6  ;;  %v118_v20 = vpack.c.bf16 %v109_v13, %v108_v12 }
  0x14   :  { %519 = vmatprep.subr.bf16.mxu0 %v562_v32  ;;  %546 = vmatprep.subr.bf16.mxu1 %v562_v32  ;;  %v102_v21 = vmax.f32 %v86_v16, 0.0  ;;  %v110_v23 = vmax.f32 %v94_v18, 0.0  ;;  %v111_v24 = vmax.f32 %v95_v19, 0.0 }
  0x15   :  { %v103_v22 = vmax.f32 %v87_v17, 0.0 }
  0x16   :  { %v119_v26 = vpack.c.bf16 %v111_v24, %v110_v23 }
  0x17   :  { %520 = vmatpush3.bf16.msra.mxu0 %v562_v32  ;;  %554 = vmatpush3.bf16.msra.mxu1 %v562_v32  ;;  %v115_v25 = vpack.c.bf16 %v103_v22, %v102_v21 }
  0x18   :  { %521 = vmatprep.subr.bf16.mxu0 %v563_v48  ;;  %547 = vmatprep.subr.bf16.mxu1 %v563_v48 }
  0x1b   :  { %522 = vmatpush3.bf16.msra.mxu0 %v563_v48  ;;  %555 = vmatpush3.bf16.msra.mxu1 %v563_v48 }
  0x1c   :  { %523 = vmatprep.subr.bf16.mxu0 %v564_v63  ;;  %548 = vmatprep.subr.bf16.mxu1 %v564_v63 }
  0x1f   :  { %524 = vmatpush3.bf16.msra.mxu0 %v564_v63  ;;  %556 = vmatpush3.bf16.msra.mxu1 %v564_v63 }
  0x22   :  { %526 = vmatmul.mubr.bf16.vlgmr.msra.gmra.mrb[0].mxu0 %v113_v14  ;;  %534 = vmatmul.mubr.bf16.vlgmr.msra.gmra.mrb[0].mxu1 %v117_v15 }
  0x23   :  { %529 = vmatprep.mubr.bf16.mxu0 %v114_v5  ;;  %537 = vmatprep.mubr.bf16.mxu1 %v118_v20 }
  0x2a   :  { %530 = vmatmul.mubr.bf16.gmra.mrb[4].mxu0 %v115_v25  ;;  %538 = vmatmul.mubr.bf16.gmra.mrb[4].mxu1 %v119_v26 }
  0xf5   :  { %v527_v27 = vpop.f32.mrb[0].mxu0  ;;  %v535_v28 = vpop.f32.mrb[0].mxu1 }
  0xf6   :  { %v218_v29 = vpop.f32.mrb[1].mxu0  ;;  %v250_v10 = vpop.f32.mrb[1].mxu1 }
  0xf7   :  { %v528_v30 = vpop.f32.mrb[2].mxu0  ;;  %v536_v31 = vpop.f32.mrb[2].mxu1 }
  0xf8   :  { %v447_v32 = vpack.c.bf16 %v528_v30, %v527_v27  ;;  %v467_v33 = vpack.c.bf16 %v536_v31, %v535_v28  ;;  %v221_v34 = vpop.f32.mrb[3].mxu0  ;;  %v253_v35 = vpop.f32.mrb[3].mxu1 }
  0xf9   :  { %v442_v36 = vpack.c.bf16 %v221_v34, %v218_v29  ;;  %v462_v37 = vpack.c.bf16 %v253_v35, %v250_v10 }
  0xfa   :  { %486 = vst [vmem:[%s708_s4 + $0x8] sm:$0xff] %v447_v32   ;;  %490 = vst [vmem:[%s708_s4 + $0x28] sm:$0xff] %v467_v33  }
  0xfb   :  { %443 = vst [vmem:[%s708_s4] sm:$0xff] %v442_v36   ;;  %489 = vst [vmem:[%s708_s4 + $0x20] sm:$0xff] %v462_v37  }
  0xfd   :  { %v531_v38 = vpop.f32.mrb[4].mxu0  ;;  %v539_v39 = vpop.f32.mrb[4].mxu1 }
  0xfe   :  { %v234_v40 = vpop.f32.mrb[5].mxu0  ;;  %v266_v41 = vpop.f32.mrb[5].mxu1 }
  0xff   :  { %v532_v42 = vpop.f32.mrb[6].mxu0  ;;  %v540_v43 = vpop.f32.mrb[6].mxu1 }
 0x100   :  { %v457_v44 = vpack.c.bf16 %v532_v42, %v531_v38  ;;  %v477_v45 = vpack.c.bf16 %v540_v43, %v539_v39  ;;  %v237_v46 = vpop.f32.mrb[7].mxu0  ;;  %v269_v47 = vpop.f32.mrb[7].mxu1 }
 0x101   :  { %v452_v48 = vpack.c.bf16 %v237_v46, %v234_v40  ;;  %v472_v49 = vpack.c.bf16 %v269_v47, %v266_v41 }
 0x102   :  { %488 = vst [vmem:[%s708_s4 + $0x18] sm:$0xff] %v457_v44   ;;  %492 = vst [vmem:[%s708_s4 + $0x38] sm:$0xff] %v477_v45  }
 0x103   :  { %487 = vst [vmem:[%s708_s4 + $0x10] sm:$0xff] %v452_v48   ;;  %491 = vst [vmem:[%s708_s4 + $0x30] sm:$0xff] %v472_v49  }

</bundles_post_ra>
